<compile_context>
chip_gen: v7x
topology: tpu7x:2x2x1
jax: 0.10.0
libtpu: 0.0.40
codegen_flags: <defaults>
</compile_context>

<pallas_src>
import functools

import jax
import jax.numpy as jnp
from jax.experimental import pallas as pl
from jax.experimental.pallas import tpu as pltpu


def _polyline_encoder_kernel(n_pre, n_mid, n_pts, c_in, x_ref, *refs):
    """One grid step == TILE_POLY whole polylines (R = TILE_POLY * n_pts rows).

    x_ref : (R, C+1)  point features with the {0,1} point-validity mask folded
                      in as the last column.
    refs  : pre-MLP (w,b)*n_pre, mid layer 1 (w1a, w1b, b1),
            mid layers 2.. (w,b)*(n_mid-1), out (w, b), out_ref.
    """
    out_ref = refs[-1]
    w = refs[:-1]

    x = x_ref[...]                                     # (R, C+1)
    m = x[:, c_in:c_in + 1].astype(jnp.float32)        # (R, 1) per-point validity

    rows = x.shape[0]
    n_poly = rows // n_pts

    idx = 0
    # ---- pre-MLP (BN folded): Linear -> ReLU, pointwise ----
    # First weight carries a zero row for the mask column, so the full (C+1)-wide
    # block feeds the MXU with no operand slicing.
    h = x
    for _ in range(n_pre):
        wi = w[idx][...]
        bi = w[idx + 1][...]
        idx += 2
        h = jnp.maximum(
            jnp.dot(h.astype(wi.dtype), wi,
                    preferred_element_type=jnp.float32) + bi, 0.0)
    h = h * m                                          # zero-fill invalid points
    hdim = h.shape[-1]

    # ---- max-pool over points; per-polyline validity ----
    pooled = jnp.max(h.reshape(n_poly, n_pts, hdim), axis=1)       # (TP, H)
    valid = jnp.max(m.reshape(n_poly, n_pts, 1), axis=1)           # (TP, 1)

    # ---- first mid layer: concat([h, pooled_rep]) @ W1 folded into a split ----
    # relu(h @ W1[:H] + broadcast(pooled @ W1[H:]) + b1)  -- exactly equivalent,
    # half the matmul FLOPs, no (R, 2H) tensor, no lane-wise concat.
    w1a = w[idx][...]
    w1b = w[idx + 1][...]
    b1 = w[idx + 2][...]
    idx += 3
    g_pt = jnp.dot(h.astype(w1a.dtype), w1a, preferred_element_type=jnp.float32)
    g_pool = jnp.dot(pooled.astype(w1b.dtype), w1b,
                     preferred_element_type=jnp.float32)
    g = g_pt.reshape(n_poly, n_pts, -1) + g_pool[:, None, :] + b1
    g = jnp.maximum(g, 0.0).reshape(rows, -1)

    # ---- remaining mid layers ----
    for _ in range(n_mid - 1):
        wi = w[idx][...]
        bi = w[idx + 1][...]
        idx += 2
        g = jnp.maximum(
            jnp.dot(g.astype(wi.dtype), wi,
                    preferred_element_type=jnp.float32) + bi, 0.0)
    g = g * m                                          # zero-fill invalid points

    poly_feat = jnp.max(g.reshape(n_poly, n_pts, g.shape[-1]), axis=1)  # (TP, H)

    # ---- output Linear (lane-padded to 128) + per-polyline valid mask ----
    w_out = w[idx][...]
    b_out = w[idx + 1][...]
    out = jnp.dot(poly_feat.astype(w_out.dtype), w_out,
                  preferred_element_type=jnp.float32) + b_out
    out_ref[...] = (out * valid).astype(out_ref.dtype)


def _choose_tile_poly(BP, T, target_rows, min_tiles):
    """Polylines per grid step: multiple of 8, ~target_rows rows per step,
    prefer a divisor of BP (no wrapper-side padding) and at least `min_tiles`
    grid steps so v7x megacore has work for both TensorCores."""
    ideal = max(8, (max(1, target_rows // T) // 8) * 8)
    cap = (BP // max(1, min_tiles) // 8) * 8
    if cap >= 8:
        ideal = min(ideal, cap)
    ideal = max(8, min(ideal, ((BP + 7) // 8) * 8))
    for tp in range(ideal, 7, -8):
        if BP % tp == 0:
            return tp
    return ideal


def polyline_encoder_forward(polylines, polylines_mask, params, *,
                             target_rows=2048, min_tiles=2, matmul_dtype=None):
    """Pallas implementation of PolylineEncoder.forward -> (B, P, out_channel).

    matmul_dtype: optionally jnp.bfloat16 to halve the HBM input stream and use
    the bf16 MXU path on v6e/v7x (accumulation and all elementwise stay f32).
    """
    B, P, T, C = polylines.shape
    pre_params, mid_params, (w_out, b_out) = params
    assert len(pre_params) >= 1 and len(mid_params) >= 1
    out_ch = w_out.shape[1]
    dt = polylines.dtype
    comp_dt = dt if matmul_dtype is None else matmul_dtype

    # ---- fold the point mask into x as one extra (lane-padded, free) column ----
    BP = B * P
    x = polylines.reshape(BP, T, C)
    m = polylines_mask.astype(dt).reshape(BP, T, 1)
    xm = jnp.concatenate([x, m], axis=-1)                        # (BP, T, C+1)

    # ---- pad T to a sublane multiple so in-kernel pooling reshapes are views ----
    T_pad = ((T + 7) // 8) * 8
    if T_pad != T:
        xm = jnp.pad(xm, ((0, 0), (0, T_pad - T), (0, 0)))       # mask col 0 => invalid

    # ---- row tiling: whole polylines, multiple of 8, prefer divisors of BP ----
    tile_poly = _choose_tile_poly(BP, T_pad, target_rows, min_tiles)
    bp_pad = pl.cdiv(BP, tile_poly) * tile_poly
    if bp_pad != BP:                                             # rare fallback path
        xm = jnp.pad(xm, ((0, bp_pad - BP), (0, 0), (0, 0)))
    n_tiles = bp_pad // tile_poly
    tile_rows = tile_poly * T_pad
    x2 = xm.reshape(bp_pad * T_pad, C + 1).astype(comp_dt)

    # ---- weight prep: zero mask row, split concat layer, lane-dense out pad ----
    def cvt(w):
        return w.astype(comp_dt)

    flat_w = []
    for li, (w, b) in enumerate(pre_params):
        if li == 0:
            w = jnp.concatenate([w, jnp.zeros((1, w.shape[1]), w.dtype)], axis=0)
        flat_w += [cvt(w), b.astype(jnp.float32)]
    w1, b1 = mid_params[0]
    hsplit = w1.shape[0] // 2
    flat_w += [cvt(w1[:hsplit]), cvt(w1[hsplit:]), b1.astype(jnp.float32)]
    for w, b in mid_params[1:]:
        flat_w += [cvt(w), b.astype(jnp.float32)]
    out_pad = ((out_ch + 127) // 128) * 128
    w_o = jnp.pad(w_out, ((0, 0), (0, out_pad - out_ch)))
    b_o = jnp.pad(b_out, ((0, 0), (0, out_pad - out_ch)))
    flat_w += [cvt(w_o), b_o.astype(jnp.float32)]

    def const_spec(arr):
        return pl.BlockSpec(arr.shape, lambda i: (0, 0))

    kernel = functools.partial(_polyline_encoder_kernel,
                               len(pre_params), len(mid_params), T_pad, C)

    out = pl.pallas_call(
        kernel,
        grid=(n_tiles,),
        in_specs=[pl.BlockSpec((tile_rows, C + 1), lambda i: (i, 0))]
                 + [const_spec(w) for w in flat_w],
        out_specs=pl.BlockSpec((tile_poly, out_pad), lambda i: (i, 0)),
        out_shape=jax.ShapeDtypeStruct((bp_pad, out_pad), dt),
        compiler_params=pltpu.CompilerParams(
            dimension_semantics=("parallel",),        # shards tiles across TCs on v7x
            vmem_limit_bytes=48 * 1024 * 1024),
    )(x2, *flat_w)

    return out[:BP, :out_ch].reshape(B, P, out_ch)


def _reference_forward(polylines, polylines_mask, params):
    """Plain-JAX reference mirroring the PyTorch semantics (for validation)."""
    pre_params, mid_params, (w_out, b_out) = params
    dt = polylines.dtype
    m = polylines_mask.astype(dt)[..., None]                     # (B,P,T,1)

    def dot(a, w):
        return jnp.einsum("...c,ch->...h", a, w,
                          precision=jax.lax.Precision.HIGHEST)

    h = polylines
    for w, b in pre_params:
        h = jnp.maximum(dot(h, w) + b, 0.0)
    h = h * m
    pooled = jnp.max(h, axis=2)                                  # (B,P,H)
    g = jnp.concatenate(
        [h, jnp.broadcast_to(pooled[:, :, None, :], h.shape)], axis=-1)
    for w, b in mid_params:
        g = jnp.maximum(dot(g, w) + b, 0.0)
    g = g * m
    poly = jnp.max(g, axis=2)                                    # (B,P,H)
    valid = (jnp.sum(polylines_mask.astype(dt), axis=-1) > 0).astype(dt)[..., None]
    return (dot(poly, w_out) + b_out) * valid


def _init_params(key, in_channel, hidden_dim, num_layers, num_pre_layers,
                 out_channel):
    def lin(k, fan_in, fan_out):
        kw, kb = jax.random.split(k)
        bound = 1.0 / (fan_in ** 0.5)
        w = jax.random.uniform(kw, (fan_in, fan_out), jnp.float32, -bound, bound)
        b = jax.random.uniform(kb, (1, fan_out), jnp.float32, -bound, bound)
        return w, b

    keys = jax.random.split(key, num_layers + 1)
    pre, mid = [], []
    ki = 0
    c_in = in_channel
    for _ in range(num_pre_layers):
        pre.append(lin(keys[ki], c_in, hidden_dim)); c_in = hidden_dim; ki += 1
    c_in = hidden_dim * 2
    for _ in range(num_layers - num_pre_layers):
        mid.append(lin(keys[ki], c_in, hidden_dim)); c_in = hidden_dim; ki += 1
    out = lin(keys[ki], hidden_dim, out_channel)
    return pre, mid, out


if __name__ == "__main__":
    config = dict(in_channel=8, hidden_dim=32, num_layers=3,
                  num_pre_layers=1, out_channel=64)
    B, P, T = 2, 8, 16   # batch, num_polylines, num_points_each_polyline

    key = jax.random.PRNGKey(0)
    k_x, k_m, k_p = jax.random.split(key, 3)
    polylines = jax.random.normal(
        k_x, (B, P, T, config["in_channel"]), jnp.float32)
    polylines_mask = jax.random.uniform(k_m, (B, P, T)) > 0.3
    # exercise the fully-invalid-polyline path of valid_mask
    polylines_mask = polylines_mask.at[0, 0].set(False)

    params = _init_params(k_p, config["in_channel"], config["hidden_dim"],
                          config["num_layers"], config["num_pre_layers"],
                          config["out_channel"])

    out = polyline_encoder_forward(polylines, polylines_mask, params)
    jax.block_until_ready(out)

    ref = _reference_forward(polylines, polylines_mask, params)
    assert out.shape == (B, P, config["out_channel"])
    assert jnp.allclose(out, ref, atol=2e-4, rtol=2e-4), \
        float(jnp.max(jnp.abs(out - ref)))

    print("KERNEL_OK")
</pallas_src>

<mosaic_0001>
module attributes {stable_mosaic.version = 11 : i64} {
  func.func @_polyline_encoder_kernel(%arg0: i32, %arg1: memref<128x9xf32, #tpu.memory_space<vmem>>, %arg2: memref<9x32xf32, #tpu.memory_space<vmem>>, %arg3: memref<1x32xf32, #tpu.memory_space<vmem>>, %arg4: memref<32x32xf32, #tpu.memory_space<vmem>>, %arg5: memref<32x32xf32, #tpu.memory_space<vmem>>, %arg6: memref<1x32xf32, #tpu.memory_space<vmem>>, %arg7: memref<32x32xf32, #tpu.memory_space<vmem>>, %arg8: memref<1x32xf32, #tpu.memory_space<vmem>>, %arg9: memref<32x128xf32, #tpu.memory_space<vmem>>, %arg10: memref<1x128xf32, #tpu.memory_space<vmem>>, %arg11: memref<8x128xf32, #tpu.memory_space<vmem>>) attributes {dimension_semantics = [#tpu.dimension_semantics<parallel>], iteration_bounds = array<i64: 2>, scalar_prefetch = 0 : i64, scratch_operands = 0 : i64, tpu.core_type = #tpu.core_type<tc>, window_params = [{transform_indices = @transform_0, window_bounds = array<i64: 128, 9>}, {pipeline_mode = #tpu.pipeline_mode<synchronous>, transform_indices = @transform_1, window_bounds = array<i64: 9, 32>}, {pipeline_mode = #tpu.pipeline_mode<synchronous>, transform_indices = @transform_2, window_bounds = array<i64: 1, 32>}, {pipeline_mode = #tpu.pipeline_mode<synchronous>, transform_indices = @transform_3, window_bounds = array<i64: 32, 32>}, {pipeline_mode = #tpu.pipeline_mode<synchronous>, transform_indices = @transform_4, window_bounds = array<i64: 32, 32>}, {pipeline_mode = #tpu.pipeline_mode<synchronous>, transform_indices = @transform_5, window_bounds = array<i64: 1, 32>}, {pipeline_mode = #tpu.pipeline_mode<synchronous>, transform_indices = @transform_6, window_bounds = array<i64: 32, 32>}, {pipeline_mode = #tpu.pipeline_mode<synchronous>, transform_indices = @transform_7, window_bounds = array<i64: 1, 32>}, {pipeline_mode = #tpu.pipeline_mode<synchronous>, transform_indices = @transform_8, window_bounds = array<i64: 32, 128>}, {pipeline_mode = #tpu.pipeline_mode<synchronous>, transform_indices = @transform_9, window_bounds = array<i64: 1, 128>}, {transform_indices = @transform_10, window_bounds = array<i64: 8, 128>}]} {
    %c0 = arith.constant 0 : index
    %c0_0 = arith.constant 0 : index
    %0 = vector.load %arg1[%c0, %c0_0] : memref<128x9xf32, #tpu.memory_space<vmem>>, vector<128x9xf32>
    %1 = vector.extract_strided_slice %0 {offsets = [0, 8], sizes = [128, 1], strides = [1, 1]} : vector<128x9xf32> to vector<128x1xf32>
    %c0_1 = arith.constant 0 : index
    %c0_2 = arith.constant 0 : index
    %2 = vector.load %arg2[%c0_1, %c0_2] : memref<9x32xf32, #tpu.memory_space<vmem>>, vector<9x32xf32>
    %c0_3 = arith.constant 0 : index
    %c0_4 = arith.constant 0 : index
    %3 = vector.load %arg3[%c0_3, %c0_4] : memref<1x32xf32, #tpu.memory_space<vmem>>, vector<1x32xf32>
    %cst = arith.constant dense<0.000000e+00> : vector<128x32xf32>
    %4 = tpu.matmul %0, %2, %cst {dimension_numbers = #tpu.dot_dimension_numbers<[1], [0], [0], [1], [0, 0, 1, 1], [], []>} : vector<128x9xf32>, vector<9x32xf32>, vector<128x32xf32> -> vector<128x32xf32>
    %5 = vector.broadcast %3 : vector<1x32xf32> to vector<128x32xf32>
    %6 = arith.addf %4, %5 : vector<128x32xf32>
    %cst_5 = arith.constant 0.000000e+00 : f32
    %7 = vector.broadcast %cst_5 : f32 to vector<128x32xf32>
    %8 = arith.maximumf %6, %7 : vector<128x32xf32>
    %9 = vector.broadcast %1 : vector<128x1xf32> to vector<128x32xf32>
    %10 = arith.mulf %8, %9 : vector<128x32xf32>
    %11 = vector.shape_cast %10 : vector<128x32xf32> to vector<8x16x32xf32>
    %cst_6 = arith.constant dense<0xFF800000> : vector<8x32xf32>
    %12 = vector.multi_reduction <maximumf>, %11, %cst_6 [1] : vector<8x16x32xf32> to vector<8x32xf32>
    %13 = vector.shape_cast %1 : vector<128x1xf32> to vector<8x16x1xf32>
    %cst_7 = arith.constant dense<0xFF800000> : vector<8x1xf32>
    %14 = vector.multi_reduction <maximumf>, %13, %cst_7 [1] : vector<8x16x1xf32> to vector<8x1xf32>
    %c0_8 = arith.constant 0 : index
    %c0_9 = arith.constant 0 : index
    %15 = vector.load %arg4[%c0_8, %c0_9] : memref<32x32xf32, #tpu.memory_space<vmem>>, vector<32x32xf32>
    %c0_10 = arith.constant 0 : index
    %c0_11 = arith.constant 0 : index
    %16 = vector.load %arg5[%c0_10, %c0_11] : memref<32x32xf32, #tpu.memory_space<vmem>>, vector<32x32xf32>
    %c0_12 = arith.constant 0 : index
    %c0_13 = arith.constant 0 : index
    %17 = vector.load %arg6[%c0_12, %c0_13] : memref<1x32xf32, #tpu.memory_space<vmem>>, vector<1x32xf32>
    %cst_14 = arith.constant dense<0.000000e+00> : vector<128x32xf32>
    %18 = tpu.matmul %10, %15, %cst_14 {dimension_numbers = #tpu.dot_dimension_numbers<[1], [0], [0], [1], [0, 0, 1, 1], [], []>} : vector<128x32xf32>, vector<32x32xf32>, vector<128x32xf32> -> vector<128x32xf32>
    %cst_15 = arith.constant dense<0.000000e+00> : vector<8x32xf32>
    %19 = tpu.matmul %12, %16, %cst_15 {dimension_numbers = #tpu.dot_dimension_numbers<[1], [0], [0], [1], [0, 0, 1, 1], [], []>} : vector<8x32xf32>, vector<32x32xf32>, vector<8x32xf32> -> vector<8x32xf32>
    %20 = vector.shape_cast %18 : vector<128x32xf32> to vector<8x16x32xf32>
    %21 = vector.shape_cast %19 : vector<8x32xf32> to vector<8x1x32xf32>
    %22 = vector.broadcast %21 : vector<8x1x32xf32> to vector<8x16x32xf32>
    %23 = arith.addf %20, %22 : vector<8x16x32xf32>
    %24 = vector.shape_cast %17 : vector<1x32xf32> to vector<1x1x32xf32>
    %25 = vector.broadcast %24 : vector<1x1x32xf32> to vector<8x16x32xf32>
    %26 = arith.addf %23, %25 : vector<8x16x32xf32>
    %cst_16 = arith.constant 0.000000e+00 : f32
    %27 = vector.broadcast %cst_16 : f32 to vector<8x16x32xf32>
    %28 = arith.maximumf %26, %27 : vector<8x16x32xf32>
    %29 = vector.shape_cast %28 : vector<8x16x32xf32> to vector<128x32xf32>
    %c0_17 = arith.constant 0 : index
    %c0_18 = arith.constant 0 : index
    %30 = vector.load %arg7[%c0_17, %c0_18] : memref<32x32xf32, #tpu.memory_space<vmem>>, vector<32x32xf32>
    %c0_19 = arith.constant 0 : index
    %c0_20 = arith.constant 0 : index
    %31 = vector.load %arg8[%c0_19, %c0_20] : memref<1x32xf32, #tpu.memory_space<vmem>>, vector<1x32xf32>
    %cst_21 = arith.constant dense<0.000000e+00> : vector<128x32xf32>
    %32 = tpu.matmul %29, %30, %cst_21 {dimension_numbers = #tpu.dot_dimension_numbers<[1], [0], [0], [1], [0, 0, 1, 1], [], []>} : vector<128x32xf32>, vector<32x32xf32>, vector<128x32xf32> -> vector<128x32xf32>
    %33 = vector.broadcast %31 : vector<1x32xf32> to vector<128x32xf32>
    %34 = arith.addf %32, %33 : vector<128x32xf32>
    %cst_22 = arith.constant 0.000000e+00 : f32
    %35 = vector.broadcast %cst_22 : f32 to vector<128x32xf32>
    %36 = arith.maximumf %34, %35 : vector<128x32xf32>
    %37 = vector.broadcast %1 : vector<128x1xf32> to vector<128x32xf32>
    %38 = arith.mulf %36, %37 : vector<128x32xf32>
    %39 = vector.shape_cast %38 : vector<128x32xf32> to vector<8x16x32xf32>
    %cst_23 = arith.constant dense<0xFF800000> : vector<8x32xf32>
    %40 = vector.multi_reduction <maximumf>, %39, %cst_23 [1] : vector<8x16x32xf32> to vector<8x32xf32>
    %c0_24 = arith.constant 0 : index
    %c0_25 = arith.constant 0 : index
    %41 = vector.load %arg9[%c0_24, %c0_25] : memref<32x128xf32, #tpu.memory_space<vmem>>, vector<32x128xf32>
    %c0_26 = arith.constant 0 : index
    %c0_27 = arith.constant 0 : index
    %42 = vector.load %arg10[%c0_26, %c0_27] : memref<1x128xf32, #tpu.memory_space<vmem>>, vector<1x128xf32>
    %cst_28 = arith.constant dense<0.000000e+00> : vector<8x128xf32>
    %43 = tpu.matmul %40, %41, %cst_28 {dimension_numbers = #tpu.dot_dimension_numbers<[1], [0], [0], [1], [0, 0, 1, 1], [], []>} : vector<8x32xf32>, vector<32x128xf32>, vector<8x128xf32> -> vector<8x128xf32>
    %44 = vector.broadcast %42 : vector<1x128xf32> to vector<8x128xf32>
    %45 = arith.addf %43, %44 : vector<8x128xf32>
    %46 = vector.broadcast %14 : vector<8x1xf32> to vector<8x128xf32>
    %47 = arith.mulf %45, %46 : vector<8x128xf32>
    %c0_29 = arith.constant 0 : index
    %c0_30 = arith.constant 0 : index
    %48 = vector.load %arg11[%c0_29, %c0_30] : memref<8x128xf32, #tpu.memory_space<vmem>>, vector<8x128xf32>
    tpu.vector_store %arg11[%c0_29, %c0_30], %47 {strides = array<i32>} : memref<8x128xf32, #tpu.memory_space<vmem>>, vector<8x128xf32>,
    return
  }
  func.func @transform_0(%arg0: i32) -> (i32, i32) {
    %c0_i32 = arith.constant 0 : i32
    %c0_i32_0 = arith.constant 0 : i32
    return %arg0, %c0_i32 : i32, i32
  }
  func.func @transform_1(%arg0: i32) -> (i32, i32) {
    %c0_i32 = arith.constant 0 : i32
    %c0_i32_0 = arith.constant 0 : i32
    %c0_i32_1 = arith.constant 0 : i32
    return %c0_i32, %c0_i32_0 : i32, i32
  }
  func.func @transform_2(%arg0: i32) -> (i32, i32) {
    %c0_i32 = arith.constant 0 : i32
    %c0_i32_0 = arith.constant 0 : i32
    %c0_i32_1 = arith.constant 0 : i32
    return %c0_i32, %c0_i32_0 : i32, i32
  }
  func.func @transform_3(%arg0: i32) -> (i32, i32) {
    %c0_i32 = arith.constant 0 : i32
    %c0_i32_0 = arith.constant 0 : i32
    %c0_i32_1 = arith.constant 0 : i32
    return %c0_i32, %c0_i32_0 : i32, i32
  }
  func.func @transform_4(%arg0: i32) -> (i32, i32) {
    %c0_i32 = arith.constant 0 : i32
    %c0_i32_0 = arith.constant 0 : i32
    %c0_i32_1 = arith.constant 0 : i32
    return %c0_i32, %c0_i32_0 : i32, i32
  }
  func.func @transform_5(%arg0: i32) -> (i32, i32) {
    %c0_i32 = arith.constant 0 : i32
    %c0_i32_0 = arith.constant 0 : i32
    %c0_i32_1 = arith.constant 0 : i32
    return %c0_i32, %c0_i32_0 : i32, i32
  }
  func.func @transform_6(%arg0: i32) -> (i32, i32) {
    %c0_i32 = arith.constant 0 : i32
    %c0_i32_0 = arith.constant 0 : i32
    %c0_i32_1 = arith.constant 0 : i32
    return %c0_i32, %c0_i32_0 : i32, i32
  }
  func.func @transform_7(%arg0: i32) -> (i32, i32) {
    %c0_i32 = arith.constant 0 : i32
    %c0_i32_0 = arith.constant 0 : i32
    %c0_i32_1 = arith.constant 0 : i32
    return %c0_i32, %c0_i32_0 : i32, i32
  }
  func.func @transform_8(%arg0: i32) -> (i32, i32) {
    %c0_i32 = arith.constant 0 : i32
    %c0_i32_0 = arith.constant 0 : i32
    %c0_i32_1 = arith.constant 0 : i32
    return %c0_i32, %c0_i32_0 : i32, i32
  }
  func.func @transform_9(%arg0: i32) -> (i32, i32) {
    %c0_i32 = arith.constant 0 : i32
    %c0_i32_0 = arith.constant 0 : i32
    %c0_i32_1 = arith.constant 0 : i32
    return %c0_i32, %c0_i32_0 : i32, i32
  }
  func.func @transform_10(%arg0: i32) -> (i32, i32) {
    %c0_i32 = arith.constant 0 : i32
    %c0_i32_0 = arith.constant 0 : i32
    return %arg0, %c0_i32 : i32, i32
  }
}

</mosaic_0001>

<bundles_post_ra>
// kernel: tpu_custom_call.1
= control target key start
LH: loop header
LB: loop body
LE: loop exit
PB: predicated region body
PF: predicated region fallthrough
CT: control target
= control target key end

     0   :  { %15 = vsyncpa [#allocation3], 0  ;;  %s2673_s0 = inlined_call_operand.vmem [shape: f32[256,9], index: 0, kind: input, shape index: {}]   ;;  %s2674_s1 = inlined_call_operand.vmem [shape: f32[9,32], index: 1, kind: input, shape index: {}]   ;;  %s2675_s2 = inlined_call_operand.vmem [shape: f32[1,32], index: 2, kind: input, shape index: {}]   ;;  %s2676_s3 = inlined_call_operand.vmem [shape: f32[32,32], index: 3, kind: input, shape index: {}]   ;;  %s2677_s4 = inlined_call_operand.vmem [shape: f32[32,32], index: 4, kind: input, shape index: {}]   ;;  %s2678_s5 = inlined_call_operand.vmem [shape: f32[1,32], index: 5, kind: input, shape index: {}]   ;;  %s2679_s6 = inlined_call_operand.vmem [shape: f32[32,32], index: 6, kind: input, shape index: {}]   ;;  %s2680_s7 = inlined_call_operand.vmem [shape: f32[1,32], index: 7, kind: input, shape index: {}]   ;;  %s2681_s8 = inlined_call_operand.vmem [shape: f32[32,128], index: 8, kind: input, shape index: {}]   ;;  %s2682_s9 = inlined_call_operand.vmem [shape: f32[1,128], index: 9, kind: input, shape index: {}]   ;;  %s2683_s10 = inlined_call_operand.hbm [shape: f32[16,128], index: 10, kind: output, shape index: {}]  }
   0x1   :  { %17 = vsyncpa [#allocation3 + $0x1], 0  ;;  %s2245_s13 = smov 0   ;;  %s2247_s14 = smov 0  }
   0x2   :  { %s2249_s15 = smov 0   ;;  %s2251_s16 = smov 0  }
   0x3 LB: > { %s2266_s17 = sadd.s32 4294967295, %s2181_s16   ;;  %s1786_s18 = sadd.s32 4294967294, %s2181_s16   ;;  %s2181_s16 = sphi %s2251_s16, %s2689_s16   ;;  %s2177_s15 = sphi %s2249_s15, %s2688_s15   ;;  %s2173_s14 = sphi %s2247_s14, %s2687_s14   ;;  %s2169_s13 = sphi %s2245_s13, %s2686_s13  }
   0x4   : > { %s2270_s19 = sadd.s32 1, %s2181_s16   ;;  %s245_s20 = sadd.s32 1, %s2177_s15 }
   0x5   : > { %s242_s21 = ssub.s32 %s2181_s16, %s2270_s19  ;;  %p255_p0 = scmp.ne.s32.totalorder %s2177_s15, %s2173_s14 }
   0x6   : > { %p243_p1 = scmp.eq.s32.totalorder %s242_s21, 0  ;;  %p256_p2 = scmp.eq.s32.totalorder %s2266_s17, 1 }
   0x7   : > { %p261_p3 = scmp.ne.s32.totalorder %s2173_s14, %s2169_s13  ;;  %p262_p4 = scmp.eq.s32.totalorder %s1786_s18, 1 }
   0x8   : > { %s2281_s22 = scalar_select %p243_p1, %s2177_s15, %s245_s20  }
   0x9   : > { %p2283_p5 = por %p256_p2, %p255_p0  ;;  %p2287_p6 = por %p262_p4, %p261_p3 }
   0xa   : > { %p1789_p7 = scmp.ge.s32.totalorder %s2181_s16, 1  ;;  %p316_p8 = scmp.lt.s32.totalorder %s2181_s16, 3 }
   0xc   : > { %p317_p9 = pnand %p1789_p7, %p316_p8 }
   0xd   : > { %v376_v0 = vld [vmem:[%s2674_s1] sm:$0xff] (!%p317_p9)  ;;  %v377_v1 = vld [vmem:[%s2674_s1 + $0x8] sm:$0x1] (!%p317_p9)  ;;  %vm434_vm0 = vcmask (!%p317_p9), 1040384   ;;  %s1791_s29 = sshll.u32 (!%p317_p9), %s2266_s17, 4  ;;  %vm2183_vm1 = vmmov (!%p317_p9), 1  }
   0xe   : > { %320 = sbr.rel (%p317_p9) target bundleno = 1009 (0x3f1), region = 60  ;;  %v2034_v2 = vpack.c.bf16 (!%p317_p9), %v377_v1, %v376_v0  ;;  %vm2035_vm2 = vmpackc.low (!%p317_p9), %vm434_vm0, %vm2183_vm1  ;;  %p355_p10 = scmp.lt.s32.totalorder (!%p317_p9), %s1791_s29, 31  ;;  %v2184_v3 = vmov (!%p317_p9), 8   ;;  %vm385_vm3 = vcmask (!%p317_p9), 72704   ;;  %vm752_vm4 = vcmask (!%p317_p9), 72768  }
   0xf   : > { %2117 = vset.pattern.permute.xlu0 (!%p317_p9), %v2184_v3  ;;  %2118 = vset.pattern.permute.xlu1 (!%p317_p9), %v2184_v3  ;;  %vm679_vm5 = vcmask (!%p317_p9), 261120   ;;  %vm2186_vm6 = vmmov (!%p317_p9), 0   ;;  %vm1035_vm7 = vcmask (!%p317_p9), 1041409   ;;  %vm1037_vm8 = vcmask (!%p317_p9), 1042434   ;;  %s351_s28 = sand.u32 (!%p317_p9), 1, %s2173_s14   ;;  %s1849_s12 = sshll.u32 (!%p317_p9), %s2266_s17, 7 }
  0x10   : > { %2036 = vmatprep.subr.msk.bf16.mxu0 (!%p317_p9), %vm2035_vm2, %v2034_v2  ;;  %vm1039_vm9 = vcmask (!%p317_p9), 1043459   ;;  %vm1041_vm10 = vcmask (!%p317_p9), 1044484   ;;  %vm1043_vm11 = vcmask (!%p317_p9), 1045509   ;;  %vm1045_vm12 = vcmask (!%p317_p9), 1046534   ;;  %s2631_s26 = scalar_lea.hbm (!%p317_p9), %s2683_s10, %s1849_s12  ;;  %s1714_s27 = scalar_lea.sflag (!%p317_p9), [#allocation3], %s351_s28 }
  0x11   : > { %2039 = vmatpush3.bf16.msk.msra.mxu0 (!%p317_p9), %vm2035_vm2, %v2034_v2  ;;  %vm1047_vm13 = vcmask (!%p317_p9), 1047559  }
  0x15   : > { %s2691_s29 = smov (!%p355_p10, %s1791_s29), 31 }
  0x16   : > { %s1792_s30 = sshll.u32 %s2691_s29, 3  ;;  %s1790_s29 = sshll.u32 %s351_s28, 3 }
  0x17   : > { %s2303_s18 = scalar_lea.vmem %s2673_s0, %s1792_s30 }
  0x18   : > { %v360_v4 = vld [vmem:[%s2303_s18] sm:$0xff]  ;;  %v361_v5 = vld [vmem:[%s2303_s18 + $0x8] sm:$0xff]  ;;  %v362_v6 = vld [vmem:[%s2303_s18 + $0x10] sm:$0xff] }
  0x19   : > { %1924 = vmatprep.mubr.msk.f32.mxu0 %vm385_vm3, %v360_v4  ;;  %600 = vperm.xlu0 %2117, %v360_v4   ;;  %v753_v7 = vsel %vm752_vm4, %v360_v4, -inf  ;;  %v754_v8 = vsel %vm752_vm4, %v361_v5, -inf  ;;  %v363_v9 = vld [vmem:[%s2303_s18 + $0x18] sm:$0xff]  ;;  %v762_v10 = vsel %vm752_vm4, %v362_v6, -inf  ;;  %v364_v12 = vld [vmem:[%s2303_s18 + $0x20] sm:$0xff]  ;;  %v365_v15 = vld [vmem:[%s2303_s18 + $0x28] sm:$0xff] }
  0x1a   : > { %1925 = vmatmul.mubr.msk.f32.vlgmr.msra.gmra.mrb[0].mxu0 %vm385_vm3, %v361_v5  ;;  %608 = vperm.xlu1 %2118, %v362_v6   ;;  %v763_v11 = vsel %vm752_vm4, %v363_v9, -inf  ;;  %v755_v13 = vmax.f32 %v753_v7, %v754_v8  ;;  %v771_v14 = vsel %vm752_vm4, %v364_v12, -inf  ;;  %v366_v16 = vld [vmem:[%s2303_s18 + $0x30] sm:$0xff]  ;;  %v367_v17 = vld [vmem:[%s2303_s18 + $0x38] sm:$0xff]  ;;  %v772_v19 = vsel %vm752_vm4, %v365_v15, -inf  ;;  %v368_v25 = vld [vmem:[%s2303_s18 + $0x40] sm:$0xff] }
  0x1b   : > { %1927 = vmatprep.mubr.msk.f32.mxu0 %vm385_vm3, %v362_v6  ;;  %v764_v18 = vmax.f32 %v762_v10, %v763_v11  ;;  %v780_v20 = vsel %vm752_vm4, %v366_v16, -inf  ;;  %v781_v21 = vsel %vm752_vm4, %v367_v17, -inf  ;;  %v773_v23 = vmax.f32 %v771_v14, %v772_v19  ;;  %v369_v26 = vld [vmem:[%s2303_s18 + $0x48] sm:$0xff]  ;;  %v370_v30 = vld [vmem:[%s2303_s18 + $0x50] sm:$0xff]  ;;  %v371_v31 = vld [vmem:[%s2303_s18 + $0x58] sm:$0xff] }
  0x1c   : > { %v756_v22 = vrot.slane %v755_v13, 4  ;;  %v782_v24 = vmax.f32 %v780_v20, %v781_v21  ;;  %v789_v28 = vsel %vm752_vm4, %v368_v25, -inf  ;;  %v790_v29 = vsel %vm752_vm4, %v369_v26, -inf  ;;  %v372_v37 = vld [vmem:[%s2303_s18 + $0x60] sm:$0xff]  ;;  %v373_v38 = vld [vmem:[%s2303_s18 + $0x68] sm:$0xff]  ;;  %v374_v43 = vld [vmem:[%s2303_s18 + $0x70] sm:$0xff] }
  0x1d   : > { %604 = vperm.xlu0 %2117, %v361_v5   ;;  %v765_v27 = vrot.slane %v764_v18, 4  ;;  %v798_v32 = vsel %vm752_vm4, %v370_v30, -inf  ;;  %v799_v33 = vsel %vm752_vm4, %v371_v31, -inf  ;;  %v774_v34 = vrot.slane %v773_v23, 4  ;;  %v375_v44 = vld [vmem:[%s2303_s18 + $0x78] sm:$0xff]  ;;  %s353_s18 = scalar_lea.vmem [#allocation2], %s1790_s29 }
  0x1e   : > { %1928 = vmatmul.mubr.msk.f32.gmra.mrb[2].mxu0 %vm385_vm3, %v363_v9  ;;  %612 = vperm.xlu1 %2118, %v363_v9   ;;  %v783_v35 = vrot.slane %v782_v24, 4  ;;  %v791_v36 = vmax.f32 %v789_v28, %v790_v29  ;;  %v757_v39 = vmax.f32 %v755_v13, %v756_v22  ;;  %v800_v40 = vmax.f32 %v798_v32, %v799_v33  ;;  %v825_v28 = vld [vmem:[%s2676_s3] sm:$0xff]  ;;  %v826_v29 = vld [vmem:[%s2676_s3 + $0x8] sm:$0xff]  ;;  %v828_v32 = vld [vmem:[%s2676_s3 + $0x18] sm:$0xff]  ;;  %s1727_s20 = sshll.u32 %s353_s18, 4  ;;  %s2189_s29 = smov [#allocation2]   ;;  %s2633_s20 = int_to_ptr.vmem [resolvable:$true] %s1727_s20 }
  0x1f   : > { %1930 = vmatprep.mubr.msk.f32.mxu0 %vm385_vm3, %v364_v12  ;;  %v807_v41 = vsel %vm752_vm4, %v372_v37, -inf  ;;  %v808_v42 = vsel %vm752_vm4, %v373_v38, -inf  ;;  %v766_v45 = vmax.f32 %v764_v18, %v765_v27  ;;  %v816_v46 = vsel %vm752_vm4, %v374_v43, -inf  ;;  %s2119_s17 = scalar_lea.vmem %s2633_s20, 128  ;;  %s2123_s30 = sshll.u32 %s2189_s29, 4  ;;  %s2124_s30 = int_to_ptr.vmem [resolvable:$false] %s2123_s30 }
  0x20   : > { %v817_v47 = vsel %vm752_vm4, %v375_v44, -inf  ;;  %v792_v48 = vrot.slane %v791_v36, 4  ;;  %v809_v49 = vmax.f32 %v807_v41, %v808_v42  ;;  %v758_v50 = vrot.slane %v757_v39, 2  ;;  %p2120_p11 = scmp.ne.s32.totalorder %s2633_s20, %s2119_s17  ;;  %s2125_s11 = scalar_lea.vmem %s2124_s30, 256 }
  0x21   : > { %616 = vperm.xlu0 %2117, %v364_v12   ;;  %v775_v51 = vmax.f32 %v773_v23, %v774_v34  ;;  %v801_v52 = vrot.slane %v800_v40, 4  ;;  %v818_v53 = vmax.f32 %v816_v46, %v817_v47  ;;  %v767_v54 = vrot.slane %v766_v45, 2  ;;  %v829_v47 = vld [vmem:[%s2677_s4] sm:$0xff]  ;;  %p2126_p0 = scmp.lt.s32.totalorder %s2633_s20, %s2124_s30  ;;  %p2127_p1 = scmp.lt.s32.totalorder %s2125_s11, %s2119_s17 }
  0x22   : > { %1931 = vmatmul.mubr.msk.f32.gmra.mrb[4].mxu0 %vm385_vm3, %v365_v15  ;;  %620 = vperm.xlu1 %2118, %v365_v15   ;;  %v784_v55 = vmax.f32 %v782_v24, %v783_v35  ;;  %v810_v56 = vrot.slane %v809_v49, 4  ;;  %v759_v57 = vmax.f32 %v757_v39, %v758_v50  ;;  %v793_v59 = vmax.f32 %v791_v36, %v792_v48  ;;  %v2377_v39 = vld [vmem:[%s2675_s2] ss:$0 sm:$0xff]  ;;  %v830_v48 = vld [vmem:[%s2677_s4 + $0x8] sm:$0xff]  ;;  %p2121_p12 = pnand %p2120_p11, %p2283_p5 }
  0x23   : > { %1933 = vmatprep.mubr.msk.f32.mxu0 %vm385_vm3, %v366_v16  ;;  %v776_v58 = vrot.slane %v775_v51, 2  ;;  %v819_v60 = vrot.slane %v818_v53, 4  ;;  %v768_v61 = vmax.f32 %v766_v45, %v767_v54  ;;  %v802_v63 = vmax.f32 %v800_v40, %v801_v52  ;;  %p2128_p2 = por %p2127_p1, %p2126_p0 }
  0x24   : > { %v785_v62 = vrot.slane %v784_v55, 2  ;;  %v760_v0 = vrot.slane %v759_v57, 1  ;;  %v794_v2 = vrot.slane %v793_v59, 2  ;;  %v811_v3 = vmax.f32 %v809_v49, %v810_v56  ;;  %p2122_p13 = pneg %p2121_p12 }
  0x25   : > { %624 = vperm.xlu0 %2117, %v366_v16   ;;  %v777_v1 = vmax.f32 %v775_v51, %v776_v58  ;;  %v769_v4 = vrot.slane %v768_v61, 1  ;;  %v803_v6 = vrot.slane %v802_v63, 2  ;;  %v820_v7 = vmax.f32 %v818_v53, %v819_v60  ;;  %v832_v60 = vld [vmem:[%s2677_s4 + $0x18] sm:$0xff] }
  0x26   : > { %1934 = vmatmul.mubr.msk.f32.gmra.mrb[6].mxu0 %vm385_vm3, %v367_v17  ;;  %628 = vperm.xlu1 %2118, %v367_v17   ;;  %v786_v5 = vmax.f32 %v784_v55, %v785_v62  ;;  %v761_v8 = vmax.f32 %v759_v57, %v760_v0  ;;  %v795_v10 = vmax.f32 %v793_v59, %v794_v2  ;;  %v812_v11 = vrot.slane %v811_v3, 2  ;;  %v831_v59 = vld [vmem:[%s2677_s4 + $0x10] sm:$0xff]  ;;  %p2129_p3 = pnand %p2128_p2, %p2122_p13 }
  0x27   : > { %1936 = vmatprep.mubr.msk.f32.mxu0 %vm385_vm3, %v368_v25  ;;  %v778_v9 = vrot.slane %v777_v1, 1  ;;  %v770_v12 = vmax.f32 %v768_v61, %v769_v4  ;;  %v804_v14 = vmax.f32 %v802_v63, %v803_v6  ;;  %v821_v15 = vrot.slane %v820_v7, 2 }
  0x28   : > { %v787_v13 = vrot.slane %v786_v5, 1  ;;  %v796_v17 = vrot.slane %v795_v10, 1  ;;  %v813_v18 = vmax.f32 %v811_v3, %v812_v11  ;;  %v2185_v34 = vmov 0.0|0.0  }
  0x29   : > { %632 = vperm.xlu0 %2117, %v368_v25   ;;  %v779_v16 = vmax.f32 %v777_v1, %v778_v9  ;;  %v805_v20 = vrot.slane %v804_v14, 1  ;;  %v822_v21 = vmax.f32 %v820_v7, %v821_v15  ;;  %v2049_v56 = vpack.c.bf16 %v830_v48, %v829_v47 }
  0x2a   : > { %1937 = vmatmul.mubr.msk.f32.gmra.mrb[8].mxu0 %vm385_vm3, %v369_v26  ;;  %636 = vperm.xlu1 %2118, %v369_v26   ;;  %v788_v19 = vmax.f32 %v786_v5, %v787_v13  ;;  %v797_v22 = vmax.f32 %v795_v10, %v796_v17  ;;  %v814_v23 = vrot.slane %v813_v18, 1  ;;  %v2187_v47 = vmov 0.0  }
  0x2b   : > { %1939 = vmatprep.mubr.msk.f32.mxu0 %vm385_vm3, %v370_v30  ;;  %v806_v24 = vmax.f32 %v804_v14, %v805_v20  ;;  %v823_v25 = vrot.slane %v822_v21, 1 }
  0x2c   : > { %v815_v26 = vmax.f32 %v813_v18, %v814_v23 }
  0x2d   : > { %640 = vperm.xlu0 %2117, %v370_v30   ;;  %v824_v27 = vmax.f32 %v822_v21, %v823_v25  ;;  %v2040_v30 = vpack.c.bf16 %v826_v29, %v825_v28 }
  0x2e   : > { %1940 = vmatmul.mubr.msk.f32.gmra.mrb[10].mxu0 %vm385_vm3, %v371_v31  ;;  %644 = vperm.xlu1 %2118, %v371_v31   ;;  %v827_v31 = vld [vmem:[%s2676_s3 + $0x10] sm:$0xff] }
  0x2f   : > { %1942 = vmatprep.mubr.msk.f32.mxu0 %vm385_vm3, %v372_v37  ;;  %2041 = vmatprep.subr.bf16.mxu0 %v2040_v30  ;;  %v2044_v33 = vpack.c.bf16 %v828_v32, %v827_v31 }
  0x30   : > { %2068 = vmatprep.subr.bf16.mxu1 %v2040_v30  ;;  %2043 = vmatpush3.bf16.msra.mxu0 %v2040_v30 }
  0x31   : > { %648 = vperm.xlu0 %2117, %v372_v37   ;;  %2070 = vmatpush3.bf16.msra.mxu1 %v2040_v30 }
  0x32   : > { %1943 = vmatmul.mubr.msk.f32.gmra.mrb[12].mxu0 %vm385_vm3, %v373_v38  ;;  %652 = vperm.xlu1 %2118, %v373_v38  }
  0x33   : > { %1945 = vmatprep.mubr.msk.f32.mxu0 %vm385_vm3, %v374_v43  ;;  %2045 = vmatprep.subr.bf16.mxu0 %v2044_v33 }
  0x34   : > { %2069 = vmatprep.subr.bf16.mxu1 %v2044_v33  ;;  %2047 = vmatpush3.bf16.msra.mxu0 %v2044_v33 }
  0x35   : > { %656 = vperm.xlu0 %2117, %v374_v43   ;;  %2071 = vmatpush3.bf16.msra.mxu1 %v2044_v33 }
  0x36   : > { %1946 = vmatmul.mubr.msk.f32.gmra.mrb[14].mxu0 %vm385_vm3, %v375_v44  ;;  %660 = vperm.xlu1 %2118, %v375_v44  }
  0x37   : > { %2048 = vmatprep.subr.bf16.mxu0 %v2185_v34 }
  0x39   : > { %1673 = vperm.xlu0 %2117, %v761_v8   ;;  %v2052_v8 = vpack.c.bf16 %v832_v60, %v831_v59 }
  0x3a   : > { %1677 = vperm.xlu1 %2118, %v770_v12  }
  0x3d   : > { %1681 = vperm.xlu0 %2117, %v779_v16  }
  0x3e   : > { %1685 = vperm.xlu1 %2118, %v788_v19  }
  0x41   : > { %1689 = vperm.xlu0 %2117, %v797_v22  }
  0x42   : > { %1693 = vperm.xlu1 %2118, %v806_v24  }
  0x45   : > { %1697 = vperm.xlu0 %2117, %v815_v26  }
  0x46   : > { %1701 = vperm.xlu1 %2118, %v824_v27  }
  0x98   : > { %v2368_v36 = vpop.permute.xlu0 %600 }
  0x99   : > { %v2366_v35 = vpop.permute.xlu1 %608 }
  0x9c   : > { %v2372_v38 = vpop.permute.xlu0 %604 }
  0x9d   : > { %v2370_v37 = vpop.permute.xlu1 %612 }
  0xa0   : > { %v2383_v45 = vpop.permute.xlu0 %616 }
  0xa1   : > { %v2380_v43 = vpop.permute.xlu1 %620 }
  0xa4   : > { %v2406_v1 = vpop.permute.xlu0 %624 }
  0xa5   : > { %v2402_v61 = vpop.permute.xlu1 %628 }
  0xa8   : > { %v2424_v23 = vpop.permute.xlu0 %632 }
  0xa9   : > { %v2420_v20 = vpop.permute.xlu1 %636 }
  0xed   : > { %v1926_v40 = vpop.f32.mrb[0].mxu0 }
  0xee   : > { %v510_v41 = vadd.f32 %v1926_v40, %v2377_v39  ;;  %v504_v42 = vpop.f32.mrb[1].mxu0 }
  0xef   : > { %v505_v44 = vadd.f32 %v2377_v39, %v504_v42 }
  0xf0   : > { %v584_v46 = vmax.f32 %v510_v41, 0.0 }
  0xf1   : > { %v583_v49 = vmax.f32 %v505_v44, 0.0  ;;  %v1929_v50 = vpop.f32.mrb[2].mxu0 }
  0xf2   : > { %v664_v51 = vmul.f32 %v2372_v38, %v584_v46  ;;  %v520_v52 = vadd.f32 %v1929_v50, %v2377_v39  ;;  %v514_v53 = vpop.f32.mrb[3].mxu0 }
  0xf3   : > { %v663_v54 = vmul.f32 %v2368_v36, %v583_v49  ;;  %v515_v55 = vadd.f32 %v2377_v39, %v514_v53 }
  0xf4   : > { %v681_v57 = vsel %vm679_vm5, %v664_v51, -inf  ;;  %v586_v58 = vmax.f32 %v520_v52, 0.0  ;;  %v2438_v52 = vpop.permute.xlu1 %644 }
  0xf5   : > { %v680_v62 = vsel %vm679_vm5, %v663_v54, -inf  ;;  %v585_v63 = vmax.f32 %v515_v55, 0.0  ;;  %v1932_v0 = vpop.f32.mrb[4].mxu0  ;;  %1956 = vmatprep.mubr.msk.f32.mxu0 %vm679_vm5, %v663_v54 }
  0xf6   : > { %v682_v2 = vmax.f32 %v680_v62, %v681_v57  ;;  %v666_v3 = vmul.f32 %v2370_v37, %v586_v58  ;;  %v530_v4 = vadd.f32 %v1932_v0, %v2377_v39  ;;  %v524_v5 = vpop.f32.mrb[5].mxu0  ;;  %1957 = vmatmul.mubr.msk.f32.vlgmr.msra.gmra.mrb[16].mxu0 %vm679_vm5, %v664_v51  ;;  %v2442_v57 = vpop.permute.xlu0 %640 }
  0xf7   : > { %v665_v6 = vmul.f32 %v2366_v35, %v585_v63  ;;  %v525_v7 = vadd.f32 %v2377_v39, %v524_v5  ;;  %2050 = vmatpush3.bf16.msra.mxu0 %v2049_v56 }
  0xf8   : > { %v683_v9 = vrot.slane %v682_v2, 4  ;;  %v690_v10 = vsel %vm679_vm5, %v666_v3, -inf  ;;  %v588_v11 = vmax.f32 %v530_v4, 0.0  ;;  %2051 = vmatprep.subr.bf16.mxu0 %v2185_v34 }
  0xf9   : > { %v689_v12 = vsel %vm679_vm5, %v665_v6, -inf  ;;  %v587_v13 = vmax.f32 %v525_v7, 0.0  ;;  %v1935_v14 = vpop.f32.mrb[6].mxu0  ;;  %1959 = vmatprep.mubr.msk.f32.mxu0 %vm679_vm5, %v665_v6 }
  0xfa   : > { %v684_v15 = vmax.f32 %v682_v2, %v683_v9  ;;  %v691_v16 = vmax.f32 %v689_v12, %v690_v10  ;;  %v668_v17 = vmul.f32 %v2380_v43, %v588_v11  ;;  %v540_v18 = vadd.f32 %v1935_v14, %v2377_v39  ;;  %v534_v19 = vpop.f32.mrb[7].mxu0  ;;  %1960 = vmatmul.mubr.msk.f32.gmra.mrb[18].mxu0 %vm679_vm5, %v666_v3 }
  0xfb   : > { %v667_v21 = vmul.f32 %v2383_v45, %v587_v13  ;;  %v535_v22 = vadd.f32 %v2377_v39, %v534_v19  ;;  %2053 = vmatpush3.bf16.msra.mxu0 %v2052_v8 }
  0xfc   : > { %v685_v24 = vrot.slane %v684_v15, 2  ;;  %v692_v25 = vrot.slane %v691_v16, 4  ;;  %v699_v26 = vsel %vm679_vm5, %v668_v17, -inf  ;;  %v590_v27 = vmax.f32 %v540_v18, 0.0  ;;  %2062 = vmatprep.subr.bf16.mxu0 %v2185_v34  ;;  %v2454_v18 = vpop.permute.xlu1 %652 }
  0xfd   : > { %v698_v28 = vsel %vm679_vm5, %v667_v21, -inf  ;;  %v589_v29 = vmax.f32 %v535_v22, 0.0  ;;  %v1938_v30 = vpop.f32.mrb[8].mxu0  ;;  %1962 = vmatprep.mubr.msk.f32.mxu0 %vm679_vm5, %v667_v21 }
  0xfe   : > { %v686_v31 = vmax.f32 %v684_v15, %v685_v24  ;;  %v693_v32 = vmax.f32 %v691_v16, %v692_v25  ;;  %v700_v33 = vmax.f32 %v698_v28, %v699_v26  ;;  %v670_v40 = vmul.f32 %v2402_v61, %v590_v27  ;;  %v544_v41 = vpop.f32.mrb[9].mxu0  ;;  %1963 = vmatmul.mubr.msk.f32.gmra.mrb[20].mxu0 %vm679_vm5, %v668_v17  ;;  %v2459_v25 = vpop.permute.xlu0 %648 }
  0xff   : > { %v550_v42 = vadd.f32 %v1938_v30, %v2377_v39  ;;  %v545_v44 = vadd.f32 %v2377_v39, %v544_v41  ;;  %v669_v46 = vmul.f32 %v2406_v1, %v589_v29  ;;  %1988 = vmatprep.mubr.msk.f32.mxu0 %vm2186_vm6, %v2187_v47 }
 0x100   : > { %v687_v48 = vrot.slane %v686_v31, 1  ;;  %v694_v49 = vrot.slane %v693_v32, 2  ;;  %v701_v50 = vrot.slane %v700_v33, 4  ;;  %v708_v51 = vsel %vm679_vm5, %v670_v40, -inf }
 0x101   : > { %v592_v53 = vmax.f32 %v550_v42, 0.0  ;;  %v591_v54 = vmax.f32 %v545_v44, 0.0  ;;  %v1941_v55 = vpop.f32.mrb[10].mxu0  ;;  %v707_v56 = vsel %vm679_vm5, %v669_v46, -inf  ;;  %1965 = vmatprep.mubr.msk.f32.mxu1 %vm679_vm5, %v669_v46 }
 0x102   : > { %v695_v58 = vmax.f32 %v693_v32, %v694_v49  ;;  %v702_v59 = vmax.f32 %v700_v33, %v701_v50  ;;  %v560_v60 = vadd.f32 %v1941_v55, %v2377_v39  ;;  %v554_v62 = vpop.f32.mrb[11].mxu0  ;;  %1966 = vmatmul.mubr.msk.f32.vlgmr.msra.gmra.mrb[0].mxu1 %vm679_vm5, %v670_v40  ;;  %v709_v2 = vmax.f32 %v707_v56, %v708_v51 }
 0x103   : > { %v672_v63 = vmul.f32 %v2420_v20, %v592_v53  ;;  %v671_v0 = vmul.f32 %v2424_v23, %v591_v54  ;;  %v555_v3 = vadd.f32 %v2377_v39, %v554_v62  ;;  %v688_v4 = vmax.f32 %v686_v31, %v687_v48 }
 0x104   : > { %v696_v5 = vrot.slane %v695_v58, 1  ;;  %v703_v6 = vrot.slane %v702_v59, 2  ;;  %v594_v7 = vmax.f32 %v560_v60, 0.0  ;;  %v710_v10 = vrot.slane %v709_v2, 4 }
 0x105   : > { %v717_v8 = vsel %vm679_vm5, %v672_v63, -inf  ;;  %v716_v9 = vsel %vm679_vm5, %v671_v0, -inf  ;;  %v593_v11 = vmax.f32 %v555_v3, 0.0  ;;  %v1944_v12 = vpop.f32.mrb[12].mxu0  ;;  %1968 = vmatprep.mubr.msk.f32.mxu1 %vm679_vm5, %v671_v0 }
 0x106   : > { %v697_v13 = vmax.f32 %v695_v58, %v696_v5  ;;  %v704_v14 = vmax.f32 %v702_v59, %v703_v6  ;;  %v718_v15 = vmax.f32 %v716_v9, %v717_v8  ;;  %v674_v16 = vmul.f32 %v2438_v52, %v594_v7  ;;  %v564_v17 = vpop.f32.mrb[13].mxu0  ;;  %1969 = vmatmul.mubr.msk.f32.gmra.mrb[2].mxu1 %vm679_vm5, %v672_v63  ;;  %v2471_v59 = vpop.permute.xlu1 %660 }
 0x107   : > { %v711_v19 = vmax.f32 %v709_v2, %v710_v10  ;;  %v673_v21 = vmul.f32 %v2442_v57, %v593_v11  ;;  %v570_v22 = vadd.f32 %v1944_v12, %v2377_v39  ;;  %v565_v24 = vadd.f32 %v2377_v39, %v564_v17  ;;  %v2476_v2 = vpop.permute.xlu0 %656 }
 0x108   : > { %v1036_v26 = vsel %vm1035_vm7, %v697_v13, %v688_v4  ;;  %v705_v27 = vrot.slane %v704_v14, 1  ;;  %v719_v28 = vrot.slane %v718_v15, 4  ;;  %v726_v29 = vsel %vm679_vm5, %v674_v16, -inf }
 0x109   : > { %v712_v30 = vrot.slane %v711_v19, 2  ;;  %v725_v31 = vsel %vm679_vm5, %v673_v21, -inf  ;;  %v596_v32 = vmax.f32 %v570_v22, 0.0  ;;  %v595_v33 = vmax.f32 %v565_v24, 0.0  ;;  %v1947_v40 = vpop.f32.mrb[14].mxu0  ;;  %1971 = vmatprep.mubr.msk.f32.mxu1 %vm679_vm5, %v673_v21 }
 0x10a   : > { %v706_v41 = vmax.f32 %v704_v14, %v705_v27  ;;  %v720_v42 = vmax.f32 %v718_v15, %v719_v28  ;;  %v727_v44 = vmax.f32 %v725_v31, %v726_v29  ;;  %v580_v46 = vadd.f32 %v1947_v40, %v2377_v39  ;;  %v574_v48 = vpop.f32.mrb[15].mxu0  ;;  %1972 = vmatmul.mubr.msk.f32.gmra.mrb[4].mxu1 %vm679_vm5, %v674_v16 }
 0x10b   : > { %v713_v49 = vmax.f32 %v711_v19, %v712_v30  ;;  %v676_v50 = vmul.f32 %v2454_v18, %v596_v32  ;;  %v675_v51 = vmul.f32 %v2459_v25, %v595_v33  ;;  %v575_v53 = vadd.f32 %v2377_v39, %v574_v48  ;;  %v1266_v48 = vld [vmem:[%s2679_s6 + $0x8] sm:$0xff] }
 0x10c   : > { %v1038_v54 = vsel %vm1037_vm8, %v706_v41, %v1036_v26  ;;  %v721_v55 = vrot.slane %v720_v42, 2  ;;  %v728_v56 = vrot.slane %v727_v44, 4  ;;  %v598_v58 = vmax.f32 %v580_v46, 0.0  ;;  %v1265_v46 = vld [vmem:[%s2679_s6] sm:$0xff] }
 0x10d   : > { %v714_v60 = vrot.slane %v713_v49, 1  ;;  %v735_v62 = vsel %vm679_vm5, %v676_v50, -inf  ;;  %v734_v63 = vsel %vm679_vm5, %v675_v51, -inf  ;;  %v597_v0 = vmax.f32 %v575_v53, 0.0  ;;  %1974 = vmatprep.mubr.msk.f32.mxu1 %vm679_vm5, %v675_v51  ;;  %v1268_v51 = vld [vmem:[%s2679_s6 + $0x18] sm:$0xff] }
 0x10e   : > { %v722_v3 = vmax.f32 %v720_v42, %v721_v55  ;;  %v729_v4 = vmax.f32 %v727_v44, %v728_v56  ;;  %v736_v39 = vmax.f32 %v734_v63, %v735_v62  ;;  %v678_v5 = vmul.f32 %v2471_v59, %v598_v58  ;;  %1975 = vmatmul.mubr.msk.f32.gmra.mrb[6].mxu1 %vm679_vm5, %v676_v50  ;;  %v1267_v50 = vld [vmem:[%s2679_s6 + $0x10] sm:$0xff] }
 0x10f   : > { %v715_v6 = vmax.f32 %v713_v49, %v714_v60  ;;  %v677_v7 = vmul.f32 %v2476_v2, %v597_v0  ;;  %v2054_v49 = vpack.c.bf16 %v1266_v48, %v1265_v46 }
 0x110   : > { %v723_v8 = vrot.slane %v722_v3, 1  ;;  %v730_v9 = vrot.slane %v729_v4, 2  ;;  %v737_v10 = vrot.slane %v736_v39, 4  ;;  %v744_v11 = vsel %vm679_vm5, %v678_v5, -inf }
 0x111   : > { %v1040_v12 = vsel %vm1039_vm9, %v715_v6, %v1038_v54  ;;  %v743_v13 = vsel %vm679_vm5, %v677_v7, -inf  ;;  %1977 = vmatprep.mubr.msk.f32.mxu1 %vm679_vm5, %v677_v7  ;;  %2055 = vmatprep.subr.bf16.mxu1 %v2054_v49 }
 0x112   : > { %v724_v14 = vmax.f32 %v722_v3, %v723_v8  ;;  %v731_v15 = vmax.f32 %v729_v4, %v730_v9  ;;  %v738_v16 = vmax.f32 %v736_v39, %v737_v10  ;;  %v745_v17 = vmax.f32 %v743_v13, %v744_v11  ;;  %1978 = vmatmul.mubr.msk.f32.gmra.mrb[8].mxu1 %vm679_vm5, %v678_v5 }
 0x113   : > { %2057 = vmatpush3.bf16.msra.mxu1 %v2054_v49  ;;  %v2188_v9 = vmov 1966171168   ;;  %v1126_v11 = vlaneseq }
 0x114   : > { %v732_v19 = vrot.slane %v731_v15, 1  ;;  %v739_v21 = vrot.slane %v738_v16, 2  ;;  %v746_v22 = vrot.slane %v745_v17, 4  ;;  %v1042_v24 = vsel %vm1041_vm10, %v724_v14, %v1040_v12 }
 0x115   : > { %v1124_v10 = vunpack.c.l.s4 %v2188_v9  ;;  %v1127_v13 = vshrl.u32 %v1126_v11, 7 }
 0x116   : > { %v733_v26 = vmax.f32 %v731_v15, %v732_v19  ;;  %v740_v27 = vmax.f32 %v738_v16, %v739_v21  ;;  %v747_v28 = vmax.f32 %v745_v17, %v746_v22 }
 0x117   : > { %v1125_v12 = vunpack.c.0.s8 %v1124_v10  ;;  %v1173_v21 = vsub.s32 0, %v1127_v13 }
 0x118   : > { %v741_v29 = vrot.slane %v740_v27, 1  ;;  %v748_v30 = vrot.slane %v747_v28, 2  ;;  %v1044_v31 = vsel %vm1043_vm11, %v733_v26, %v1042_v24 }
 0x119   : > { %v1128_v14 = vsub.s32 %v1125_v12, %v1127_v13 }
 0x11a   : > { %v742_v32 = vmax.f32 %v740_v27, %v741_v29  ;;  %v749_v33 = vmax.f32 %v747_v28, %v748_v30 }
 0x11c   : > { %v750_v40 = vrot.slane %v749_v33, 1  ;;  %v1046_v41 = vsel %vm1045_vm12, %v742_v32, %v1044_v31 }
 0x11e   : > { %v751_v42 = vmax.f32 %v749_v33, %v750_v40 }
 0x120   : > { %v1048_v44 = vsel %vm1047_vm13, %v751_v42, %v1046_v41  ;;  %v2508_v42 = vld [vmem:[%s2678_s5] ss:$0 sm:$0xff] }
 0x121   : > { %1989 = vmatmul.mubr.msk.f32.vlgmr.msra.gmra.mrb[22].mxu0 %vm679_vm5, %v1048_v44 }
 0x122   : > { %2031 = vmatprep.mubr.msk.f32.mxu0 %vm2186_vm6, %v2187_v47  ;;  %v2058_v47 = vpack.c.bf16 %v1268_v51, %v1267_v50 }
 0x124   : > { %2059 = vmatprep.subr.bf16.mxu1 %v2058_v47 }
 0x125   : > { %2061 = vmatpush3.bf16.msra.mxu1 %v2058_v47 }
 0x1c9   : > { %v1958_v53 = vpop.f32.mrb[16].mxu0 }
 0x1ca   : > { %v948_v54 = vpop.f32.mrb[17].mxu0 }
 0x1cd   : > { %v1961_v55 = vpop.f32.mrb[18].mxu0 }
 0x1ce   : > { %v958_v56 = vpop.f32.mrb[19].mxu0 }
 0x1d1   : > { %v1964_v58 = vpop.f32.mrb[20].mxu0 }
 0x1d2   : > { %v968_v60 = vpop.f32.mrb[21].mxu0 }
 0x1d5   : > { %v1967_v62 = vpop.f32.mrb[0].mxu1 }
 0x1d6   : > { %v978_v63 = vpop.f32.mrb[1].mxu1 }
 0x1d9   : > { %v1970_v0 = vpop.f32.mrb[2].mxu1 }
 0x1da   : > { %v988_v3 = vpop.f32.mrb[3].mxu1 }
 0x1dd   : > { %v1973_v4 = vpop.f32.mrb[4].mxu1 }
 0x1de   : > { %v998_v39 = vpop.f32.mrb[5].mxu1 }
 0x1e1   : > { %v1976_v5 = vpop.f32.mrb[6].mxu1 }
 0x1e2   : > { %v1008_v6 = vpop.f32.mrb[7].mxu1 }
 0x1e5   : > { %v1979_v7 = vpop.f32.mrb[8].mxu1 }
 0x1e6   : > { %v1018_v8 = vpop.f32.mrb[9].mxu1 }
 0x1f4   : > { %v1117_v15 = vpop.f32.mrb[22].mxu0 }
 0x1f5   : > { %v1122_v16 = vcombine.high %v1117_v15, %v1117_v15  ;;  %v1129_v17 = vrot.slane %v1117_v15, %v1128_v14  ;;  %v1990_v19 = vpop.f32.mrb[23].mxu0 }
 0x1f7   : > { %v1136_v22 = vrot.slane %v1122_v16, %v1128_v14  ;;  %v1137_v24 = vcombine.high %v1129_v17, %v1129_v17  ;;  %v1145_v26 = vrot.slane %v1129_v17, %v1128_v14 }
 0x1f9   : > { %v1138_v27 = vcombine.high %v1136_v22, %v1136_v22  ;;  %v1152_v28 = vrot.slane %v1136_v22, %v1128_v14  ;;  %v1159_v29 = vrot.slane %v1137_v24, %v1128_v14  ;;  %v1167_v30 = vcombine.high %v1145_v26, %v1145_v26 }
 0x1fa   : > { %v1174_v31 = vrot.slane %v1145_v26, %v1173_v21 }
 0x1fb   : > { %v1166_v32 = vrot.slane %v1138_v27, %v1128_v14  ;;  %v1168_v33 = vcombine.high %v1152_v28, %v1152_v28  ;;  %v1169_v40 = vcombine.high %v1159_v29, %v1159_v29  ;;  %v1178_v41 = vrot.slane %v1159_v29, %v1173_v21 }
 0x1fc   : > { %v1182_v44 = vrot.slane %v1167_v30, %v1173_v21  ;;  %v1190_v46 = vrot.slane %v1152_v28, %v1173_v21  ;;  %v1211_v48 = vadd.f32 %v1174_v31, %v948_v54  ;;  %v1212_v49 = vadd.f32 %v1958_v53, %v1174_v31 }
 0x1fd   : > { %v1186_v50 = vrot.slane %v1169_v40, %v1173_v21  ;;  %v1213_v51 = vadd.f32 %v1178_v41, %v958_v56  ;;  %v1214_v47 = vadd.f32 %v1961_v55, %v1178_v41  ;;  %v1170_v11 = vcombine.high %v1166_v32, %v1166_v32 }
 0x1fe   : > { %v1215_v9 = vadd.f32 %v1182_v44, %v968_v60  ;;  %v1216_v10 = vadd.f32 %v1964_v58, %v1182_v44  ;;  %v1219_v12 = vadd.f32 %v1190_v46, %v988_v3  ;;  %v1220_v13 = vadd.f32 %v1970_v0, %v1190_v46 }
 0x1ff   : > { %v1234_v14 = vadd.f32 %v2508_v42, %v1212_v49  ;;  %v1194_v15 = vrot.slane %v1166_v32, %v1173_v21  ;;  %v1198_v16 = vrot.slane %v1168_v33, %v1173_v21  ;;  %v1233_v17 = vadd.f32 %v2508_v42, %v1211_v48 }
 0x200   : > { %v1235_v19 = vadd.f32 %v2508_v42, %v1213_v51  ;;  %v1217_v24 = vadd.f32 %v1186_v50, %v978_v63  ;;  %v1218_v54 = vadd.f32 %v1967_v62, %v1186_v50  ;;  %v1202_v56 = vrot.slane %v1170_v11, %v1173_v21  ;;  %v1573_v11 = vld [vmem:[%s2681_s8] sm:$0xff] }
 0x201   : > { %v1250_v22 = vmax.f32 %v1234_v14, 0.0  ;;  %v1249_v53 = vmax.f32 %v1233_v17, 0.0  ;;  %v1236_v55 = vadd.f32 %v2508_v42, %v1214_v47  ;;  %v1237_v58 = vadd.f32 %v2508_v42, %v1215_v9  ;;  %v1576_v14 = vld [vmem:[%s2681_s8 + $0x18] sm:$0xff] }
 0x202   : > { %v1251_v26 = vmax.f32 %v1235_v19, 0.0  ;;  %v1221_v60 = vadd.f32 %v1194_v15, %v998_v39  ;;  %v1222_v0 = vadd.f32 %v1973_v4, %v1194_v15  ;;  %v1223_v3 = vadd.f32 %v1198_v16, %v1008_v6 }
 0x203   : > { %1999 = vmatprep.mubr.msk.f32.mxu1 %vm679_vm5, %v1249_v53  ;;  %v1224_v27 = vadd.f32 %v1976_v5, %v1198_v16  ;;  %v1252_v28 = vmax.f32 %v1236_v55, 0.0  ;;  %v1238_v62 = vadd.f32 %v2508_v42, %v1216_v10  ;;  %v1225_v63 = vadd.f32 %v1202_v56, %v1018_v8  ;;  %v2558_v16 = vld [vmem:[%s2680_s7] ss:$0 sm:$0xff] }
 0x204   : > { %2000 = vmatmul.mubr.msk.f32.vlgmr.msra.gmra.mrb[10].mxu1 %vm679_vm5, %v1250_v22  ;;  %v1226_v29 = vadd.f32 %v1979_v7, %v1202_v56  ;;  %v1253_v21 = vmax.f32 %v1237_v58, 0.0  ;;  %v1239_v30 = vadd.f32 %v2508_v42, %v1217_v24  ;;  %v1240_v4 = vadd.f32 %v2508_v42, %v1218_v54 }
 0x205   : > { %2002 = vmatprep.mubr.msk.f32.mxu1 %vm679_vm5, %v1251_v26  ;;  %v1254_v39 = vmax.f32 %v1238_v62, 0.0  ;;  %v1241_v5 = vadd.f32 %v2508_v42, %v1219_v12  ;;  %v1242_v7 = vadd.f32 %v2508_v42, %v1220_v13  ;;  %v1243_v32 = vadd.f32 %v2508_v42, %v1221_v60  ;;  %v1574_v12 = vld [vmem:[%s2681_s8 + $0x8] sm:$0xff] }
 0x206   : > { %v1255_v6 = vmax.f32 %v1239_v30, 0.0  ;;  %v1256_v31 = vmax.f32 %v1240_v4, 0.0  ;;  %v1244_v40 = vadd.f32 %v2508_v42, %v1222_v0  ;;  %v1245_v44 = vadd.f32 %v2508_v42, %v1223_v3 }
 0x207   : > { %v1257_v8 = vmax.f32 %v1241_v5, 0.0  ;;  %v1258_v33 = vmax.f32 %v1242_v7, 0.0  ;;  %v1259_v41 = vmax.f32 %v1243_v32, 0.0  ;;  %v1246_v48 = vadd.f32 %v2508_v42, %v1224_v27 }
 0x208   : > { %2003 = vmatmul.mubr.msk.f32.gmra.mrb[12].mxu1 %vm679_vm5, %v1252_v28  ;;  %v1260_v46 = vmax.f32 %v1244_v40, 0.0  ;;  %v1261_v49 = vmax.f32 %v1245_v44, 0.0  ;;  %v1247_v50 = vadd.f32 %v2508_v42, %v1225_v63  ;;  %v1248_v47 = vadd.f32 %v2508_v42, %v1226_v29  ;;  %v1575_v42 = vld [vmem:[%s2681_s8 + $0x10] sm:$0xff] }
 0x209   : > { %2005 = vmatprep.mubr.msk.f32.mxu1 %vm679_vm5, %v1253_v21  ;;  %v1262_v51 = vmax.f32 %v1246_v48, 0.0  ;;  %v2063_v13 = vpack.c.bf16 %v1574_v12, %v1573_v11  ;;  %v2066_v15 = vpack.c.bf16 %v1576_v14, %v1575_v42 }
 0x20a   : > { %v1263_v9 = vmax.f32 %v1247_v50, 0.0  ;;  %v1264_v10 = vmax.f32 %v1248_v47, 0.0 }
 0x20b   : > { %2064 = vmatpush3.bf16.msra.mxu0 %v2063_v13 }
 0x20c   : > { %2006 = vmatmul.mubr.msk.f32.gmra.mrb[14].mxu1 %vm679_vm5, %v1254_v39  ;;  %2065 = vmatprep.subr.bf16.mxu0 %v2185_v34 }
 0x20d   : > { %2008 = vmatprep.mubr.msk.f32.mxu1 %vm679_vm5, %v1255_v6 }
 0x20f   : > { %2067 = vmatpush3.bf16.msra.mxu0 %v2066_v15 }
 0x210   : > { %2009 = vmatmul.mubr.msk.f32.gmra.mrb[16].mxu1 %vm679_vm5, %v1256_v31 }
 0x211   : > { %2011 = vmatprep.mubr.msk.f32.mxu1 %vm679_vm5, %v1257_v8 }
 0x214   : > { %2012 = vmatmul.mubr.msk.f32.gmra.mrb[18].mxu1 %vm679_vm5, %v1258_v33 }
 0x215   : > { %2014 = vmatprep.mubr.msk.f32.mxu1 %vm679_vm5, %v1259_v41 }
 0x218   : > { %2015 = vmatmul.mubr.msk.f32.gmra.mrb[20].mxu1 %vm679_vm5, %v1260_v46 }
 0x219   : > { %2017 = vmatprep.mubr.msk.f32.mxu1 %vm679_vm5, %v1261_v49 }
 0x21c   : > { %2018 = vmatmul.mubr.msk.f32.gmra.mrb[22].mxu1 %vm679_vm5, %v1262_v51 }
 0x21d   : > { %2020 = vmatprep.mubr.msk.f32.mxu1 %vm679_vm5, %v1263_v9 }
 0x220   : > { %2021 = vmatmul.mubr.msk.f32.gmra.mrb[24].mxu1 %vm679_vm5, %v1264_v10 }
 0x2d7   : > { %v2001_v17 = vpop.f32.mrb[10].mxu1 }
 0x2d8   : > { %v1396_v19 = vadd.f32 %v2001_v17, %v2558_v16  ;;  %v1390_v22 = vpop.f32.mrb[11].mxu1 }
 0x2d9   : > { %v1391_v24 = vadd.f32 %v2558_v16, %v1390_v22 }
 0x2da   : > { %v1470_v54 = vmax.f32 %v1396_v19, 0.0 }
 0x2db   : > { %v1469_v53 = vmax.f32 %v1391_v24, 0.0  ;;  %v2004_v26 = vpop.f32.mrb[12].mxu1 }
 0x2dc   : > { %v1486_v56 = vmul.f32 %v1470_v54, %v2372_v38  ;;  %v1406_v55 = vadd.f32 %v2004_v26, %v2558_v16  ;;  %v1400_v34 = vpop.f32.mrb[13].mxu1 }
 0x2dd   : > { %v1485_v58 = vmul.f32 %v1469_v53, %v2368_v36  ;;  %v1401_v60 = vadd.f32 %v2558_v16, %v1400_v34 }
 0x2de   : > { %v1502_v0 = vsel %vm679_vm5, %v1486_v56, -inf  ;;  %v1472_v3 = vmax.f32 %v1406_v55, 0.0 }
 0x2df   : > { %v1501_v27 = vsel %vm679_vm5, %v1485_v58, -inf  ;;  %v1471_v28 = vmax.f32 %v1401_v60, 0.0  ;;  %v2007_v62 = vpop.f32.mrb[14].mxu1 }
 0x2e0   : > { %v1503_v63 = vmax.f32 %v1501_v27, %v1502_v0  ;;  %v1488_v29 = vmul.f32 %v1472_v3, %v2370_v37  ;;  %v1416_v21 = vadd.f32 %v2007_v62, %v2558_v16  ;;  %v1410_v38 = vpop.f32.mrb[15].mxu1 }
 0x2e1   : > { %v1487_v30 = vmul.f32 %v1471_v28, %v2366_v35  ;;  %v1411_v39 = vadd.f32 %v2558_v16, %v1410_v38 }
 0x2e2   : > { %v1504_v36 = vrot.slane %v1503_v63, 4  ;;  %v1511_v4 = vsel %vm679_vm5, %v1488_v29, -inf  ;;  %v1474_v6 = vmax.f32 %v1416_v21, 0.0 }
 0x2e3   : > { %v1510_v5 = vsel %vm679_vm5, %v1487_v30, -inf  ;;  %v1473_v31 = vmax.f32 %v1411_v39, 0.0  ;;  %v2010_v7 = vpop.f32.mrb[16].mxu1 }
 0x2e4   : > { %v1505_v8 = vmax.f32 %v1503_v63, %v1504_v36  ;;  %v1512_v32 = vmax.f32 %v1510_v5, %v1511_v4  ;;  %v1490_v33 = vmul.f32 %v1474_v6, %v2380_v43  ;;  %v1426_v37 = vadd.f32 %v2010_v7, %v2558_v16  ;;  %v1420_v40 = vpop.f32.mrb[17].mxu1 }
 0x2e5   : > { %v1489_v41 = vmul.f32 %v1473_v31, %v2383_v45  ;;  %v1421_v35 = vadd.f32 %v2558_v16, %v1420_v40 }
 0x2e6   : > { %v1506_v44 = vrot.slane %v1505_v8, 2  ;;  %v1513_v46 = vrot.slane %v1512_v32, 4  ;;  %v1520_v48 = vsel %vm679_vm5, %v1490_v33, -inf  ;;  %v1476_v49 = vmax.f32 %v1426_v37, 0.0 }
 0x2e7   : > { %v1519_v50 = vsel %vm679_vm5, %v1489_v41, -inf  ;;  %v1475_v51 = vmax.f32 %v1421_v35, 0.0  ;;  %v2013_v47 = vpop.f32.mrb[18].mxu1 }
 0x2e8   : > { %v1507_v9 = vmax.f32 %v1505_v8, %v1506_v44  ;;  %v1514_v10 = vmax.f32 %v1512_v32, %v1513_v46  ;;  %v1521_v11 = vmax.f32 %v1519_v50, %v1520_v48  ;;  %v1492_v43 = vmul.f32 %v1476_v49, %v2402_v61  ;;  %v1430_v12 = vpop.f32.mrb[19].mxu1 }
 0x2e9   : > { %v1491_v13 = vmul.f32 %v1475_v51, %v2406_v1  ;;  %v1436_v45 = vadd.f32 %v2013_v47, %v2558_v16  ;;  %v1431_v42 = vadd.f32 %v2558_v16, %v1430_v12 }
 0x2ea   : > { %v1508_v14 = vrot.slane %v1507_v9, 1  ;;  %v1515_v15 = vrot.slane %v1514_v10, 2  ;;  %v1522_v17 = vrot.slane %v1521_v11, 4  ;;  %v1529_v19 = vsel %vm679_vm5, %v1492_v43, -inf }
 0x2eb   : > { %v1528_v22 = vsel %vm679_vm5, %v1491_v13, -inf  ;;  %v1478_v24 = vmax.f32 %v1436_v45, 0.0  ;;  %v1477_v54 = vmax.f32 %v1431_v42, 0.0  ;;  %v2016_v53 = vpop.f32.mrb[20].mxu1 }
 0x2ec   : > { %v1516_v26 = vmax.f32 %v1514_v10, %v1515_v15  ;;  %v1523_v56 = vmax.f32 %v1521_v11, %v1522_v17  ;;  %v1530_v61 = vmax.f32 %v1528_v22, %v1529_v19  ;;  %v1440_v55 = vpop.f32.mrb[21].mxu1  ;;  %v1446_v58 = vadd.f32 %v2016_v53, %v2558_v16 }
 0x2ed   : > { %v1494_v1 = vmul.f32 %v1478_v24, %v2420_v20  ;;  %v1493_v34 = vmul.f32 %v1477_v54, %v2424_v23  ;;  %v1441_v60 = vadd.f32 %v2558_v16, %v1440_v55  ;;  %v1509_v0 = vmax.f32 %v1507_v9, %v1508_v14 }
 0x2ee   : > { %v1517_v3 = vrot.slane %v1516_v26, 1  ;;  %v1524_v27 = vrot.slane %v1523_v56, 2  ;;  %v1531_v28 = vrot.slane %v1530_v61, 4  ;;  %v1480_v29 = vmax.f32 %v1446_v58, 0.0 }
 0x2ef   : > { %v1538_v62 = vsel %vm679_vm5, %v1494_v1, -inf  ;;  %v1537_v63 = vsel %vm679_vm5, %v1493_v34, -inf  ;;  %v1479_v21 = vmax.f32 %v1441_v60, 0.0  ;;  %v2019_v38 = vpop.f32.mrb[22].mxu1 }
 0x2f0   : > { %v1518_v30 = vmax.f32 %v1516_v26, %v1517_v3  ;;  %v1525_v39 = vmax.f32 %v1523_v56, %v1524_v27  ;;  %v1532_v20 = vmax.f32 %v1530_v61, %v1531_v28  ;;  %v1539_v36 = vmax.f32 %v1537_v63, %v1538_v62  ;;  %v1450_v23 = vpop.f32.mrb[23].mxu1 }
 0x2f1   : > { %v1496_v4 = vmul.f32 %v1480_v29, %v2438_v52  ;;  %v1495_v6 = vmul.f32 %v1479_v21, %v2442_v57  ;;  %v1456_v5 = vadd.f32 %v2019_v38, %v2558_v16  ;;  %v1451_v31 = vadd.f32 %v2558_v16, %v1450_v23  ;;  %v1678_v23 = vpop.permute.xlu1 %1677 }
 0x2f2   : > { %v1592_v7 = vsel %vm1035_vm7, %v1518_v30, %v1509_v0  ;;  %v1526_v8 = vrot.slane %v1525_v39, 1  ;;  %v1533_v32 = vrot.slane %v1532_v20, 2  ;;  %v1540_v33 = vrot.slane %v1539_v36, 4 }
 0x2f3   : > { %v1547_v37 = vsel %vm679_vm5, %v1496_v4, -inf  ;;  %v1546_v40 = vsel %vm679_vm5, %v1495_v6, -inf  ;;  %v1482_v41 = vmax.f32 %v1456_v5, 0.0  ;;  %v1481_v35 = vmax.f32 %v1451_v31, 0.0  ;;  %v2022_v44 = vpop.f32.mrb[24].mxu1 }
 0x2f4   : > { %v1527_v46 = vmax.f32 %v1525_v39, %v1526_v8  ;;  %v1534_v52 = vmax.f32 %v1532_v20, %v1533_v32  ;;  %v1541_v48 = vmax.f32 %v1539_v36, %v1540_v33  ;;  %v1548_v57 = vmax.f32 %v1546_v40, %v1547_v37  ;;  %v1460_v49 = vpop.f32.mrb[25].mxu1  ;;  %v1674_v36 = vpop.permute.xlu0 %1673 }
 0x2f5   : > { %v1498_v50 = vmul.f32 %v1482_v41, %v2454_v18  ;;  %v1497_v51 = vmul.f32 %v1481_v35, %v2459_v25  ;;  %v1466_v47 = vadd.f32 %v2022_v44, %v2558_v16  ;;  %v1461_v9 = vadd.f32 %v2558_v16, %v1460_v49  ;;  %v1686_v31 = vpop.permute.xlu1 %1685  ;;  %v1846_v41 = vld [vmem:[%s2682_s9] ss:$0 sm:$0xff] }
 0x2f6   : > { %v1593_v10 = vsel %vm1037_vm8, %v1527_v46, %v1592_v7  ;;  %v1535_v11 = vrot.slane %v1534_v52, 1  ;;  %v1542_v43 = vrot.slane %v1541_v48, 2  ;;  %v1549_v12 = vrot.slane %v1548_v57, 4 }
 0x2f7   : > { %v1556_v13 = vsel %vm679_vm5, %v1498_v50, -inf  ;;  %v1555_v45 = vsel %vm679_vm5, %v1497_v51, -inf  ;;  %v1484_v42 = vmax.f32 %v1466_v47, 0.0  ;;  %v1483_v14 = vmax.f32 %v1461_v9, 0.0 }
 0x2f8   : > { %v1536_v15 = vmax.f32 %v1534_v52, %v1535_v11  ;;  %v1543_v17 = vmax.f32 %v1541_v48, %v1542_v43  ;;  %v1550_v18 = vmax.f32 %v1548_v57, %v1549_v12  ;;  %v1557_v19 = vmax.f32 %v1555_v45, %v1556_v13  ;;  %v1682_v6 = vpop.permute.xlu0 %1681 }
 0x2f9   : > { %v1500_v25 = vmul.f32 %v1484_v42, %v2471_v59  ;;  %v1499_v22 = vmul.f32 %v1483_v14, %v2476_v2  ;;  %v1703_v4 = vsel %vm1035_vm7, %v1678_v23, %v1674_v36  ;;  %v1694_v33 = vpop.permute.xlu1 %1693 }
 0x2fa   : > { %v1544_v16 = vrot.slane %v1543_v17, 1  ;;  %v1551_v24 = vrot.slane %v1550_v18, 2  ;;  %v1558_v54 = vrot.slane %v1557_v19, 4  ;;  %v1594_v53 = vsel %vm1039_vm9, %v1536_v15, %v1593_v10 }
 0x2fb   : > { %v1565_v26 = vsel %vm679_vm5, %v1500_v25, -inf  ;;  %v1564_v56 = vsel %vm679_vm5, %v1499_v22, -inf  ;;  %v1704_v5 = vsel %vm1037_vm8, %v1682_v6, %v1703_v4 }
 0x2fc   : > { %v1545_v61 = vmax.f32 %v1543_v17, %v1544_v16  ;;  %v1552_v55 = vmax.f32 %v1550_v18, %v1551_v24  ;;  %v1559_v1 = vmax.f32 %v1557_v19, %v1558_v54  ;;  %v1566_v34 = vmax.f32 %v1564_v56, %v1565_v26  ;;  %v1690_v8 = vpop.permute.xlu0 %1689 }
 0x2fd   : > { %v1705_v7 = vsel %vm1039_vm9, %v1686_v31, %v1704_v5  ;;  %v1702_v44 = vpop.permute.xlu1 %1701 }
 0x2fe   : > { %v1553_v58 = vrot.slane %v1552_v55, 1  ;;  %v1560_v60 = vrot.slane %v1559_v1, 2  ;;  %v1567_v0 = vrot.slane %v1566_v34, 4  ;;  %v1595_v59 = vsel %vm1041_vm10, %v1545_v61, %v1594_v53 }
 0x2ff   : > { %v1706_v32 = vsel %vm1041_vm10, %v1690_v8, %v1705_v7 }
 0x300   : > { %v1554_v3 = vmax.f32 %v1552_v55, %v1553_v58  ;;  %v1561_v2 = vmax.f32 %v1559_v1, %v1560_v60  ;;  %v1568_v27 = vmax.f32 %v1566_v34, %v1567_v0  ;;  %v1707_v37 = vsel %vm1043_vm11, %v1694_v33, %v1706_v32  ;;  %v1698_v40 = vpop.permute.xlu0 %1697 }
 0x301   : > { %v1708_v35 = vsel %vm1045_vm12, %v1698_v40, %v1707_v37 }
 0x302   : > { %v1562_v28 = vrot.slane %v1561_v2, 1  ;;  %v1569_v62 = vrot.slane %v1568_v27, 2  ;;  %v1596_v63 = vsel %vm1043_vm11, %v1554_v3, %v1595_v59  ;;  %v1709_v57 = vsel %vm1047_vm13, %v1702_v44, %v1708_v35 }
 0x304   : > { %v1563_v29 = vmax.f32 %v1561_v2, %v1562_v28  ;;  %v1570_v21 = vmax.f32 %v1568_v27, %v1569_v62 }
 0x306   : > { %v1571_v38 = vrot.slane %v1570_v21, 1  ;;  %v1597_v30 = vsel %vm1045_vm12, %v1563_v29, %v1596_v63 }
 0x308   : > { %v1572_v39 = vmax.f32 %v1570_v21, %v1571_v38 }
 0x30a   : > { %v1598_v20 = vsel %vm1047_vm13, %v1572_v39, %v1597_v30 }
 0x30b   : > { %2032 = vmatmul.mubr.msk.f32.vlgmr.msra.gmra.mrb[24].mxu0 %vm679_vm5, %v1598_v20 }
 0x3de   : > { %v1667_v46 = vpop.f32.mrb[24].mxu0 }
 0x3df   : > { %v1668_v52 = vadd.f32 %v1846_v41, %v1667_v46  ;;  %v2033_v48 = vpop.f32.mrb[25].mxu0 }
 0x3e1   : > { %v1711_v49 = vmul.f32 %v1709_v57, %v1668_v52 }
 0x3e3   : > { %1712 = vst [vmem:[%s353_s18] sm:$0xff] %v1711_v49 }
 0x3e4   : > { %2132 = shalt.err (!%p2129_p3)
}
 0x3e5   : > { %s2133_s28 = scalar_lea.hbm %s2631_s26, 128  ;;  %s2137_s21 = scalar_lea.hbm %s2683_s10, 256 }
 0x3e6   : > { %p2134_p4 = scmp.ne.s32.totalorder %s2631_s26, %s2133_s28  ;;  %p2138_p9 = scmp.lt.u32.totalorder %s2631_s26, %s2683_s10 }
 0x3e7   : > { %p2139_p10 = scmp.lt.u32.totalorder %s2137_s21, %s2133_s28  ;;  %p2141_p12 = scmp.lt.u32.totalorder %s2133_s28, %s2631_s26 }
 0x3e8   : > { %p2135_p7 = pnand %p2134_p4, %p2283_p5 }
 0x3e9   : > { %p2140_p11 = por %p2139_p10, %p2138_p9 }
 0x3ea   : > { %p2136_p8 = pneg %p2135_p7 }
 0x3eb   : > { %p2142_p13 = por %p2141_p12, %p2140_p11 }
 0x3ed   : > { %p2143_p0 = pnand %p2142_p13, %p2136_p8 }
 0x3ef   : > { %2146 = shalt.err (!%p2143_p0)
}
 0x3f0   : > { %2072 = dma.vmem_to_hbm [thread:$0]  (%p2283_p5), %s2633_s20, 128, %s2631_s26, %s1714_s27  }
 0x3f1 PF: > { %p2078_p1 = scmp.ge.s32.totalorder %s2181_s16, 2  ;;  %s1739_s17 = sand.u32 1, %s2169_s13  }
 0x3f2   : > { %s1740_s30 = scalar_lea.sflag [#allocation3], %s1739_s17 }
 0x3f3   : > { %p2075_p2 = pnand %p2078_p1, %p2287_p6 }
 0x3f5   : > { %2164 = dma.done.wait (!%p2075_p2), %s1740_s30, 128  }
 0x3f6   : > { %2166 = vsyncadd (!%p2075_p2), %s1740_s30, 4294967168  ;;  %p20_p3 = scmp.ge.s32.totalorder %s2270_s19, 4   ;;  %s2686_s13 = smov %s2173_s14 }
 0x3f7   : > { %s2687_s14 = smov %s2177_s15  ;;  %s2688_s15 = smov %s2281_s22 }
 0x3f8   : > { %s2689_s16 = smov %s2270_s19  ;;  %22 = sbr.rel (!%p20_p3) target bundleno = 3 (0x3), region = 95 }
 0x3ff   :  { %1745 = vsyncpa [#allocation3], 1 }
 0x400   :  { %1747 = vsyncpa [#allocation3 + $0x1], 1 }

</bundles_post_ra>
